<compile_context>
chip_gen: v7x
topology: tpu7x:2x2x1
jax: 0.10.0
libtpu: 0.0.40
codegen_flags: <defaults>
</compile_context>

<pallas_src>
import functools

import numpy as np
import jax
import jax.numpy as jnp
from jax.experimental import pallas as pl
from jax.experimental.pallas import tpu as pltpu

EPS = 1e-5  # PyTorch BatchNorm2d default eps


# --------------------------------- kernel ----------------------------------
def _bn_train(acc, mask, inv_cnt, gamma, beta):
    """Training-mode BatchNorm over the lane axis, restricted to valid positions.

    acc   : (C, L) conv accumulator (junk at invalid positions)
    mask  : (1, L) 1.0 at valid positions, 0.0 elsewhere
    gamma, beta : (C, 1)
    """
    mean = jnp.sum(acc * mask, axis=-1, keepdims=True) * inv_cnt       # (C, 1)
    d = acc - mean
    var = jnp.sum(d * d * mask, axis=-1, keepdims=True) * inv_cnt      # (C, 1), biased
    return d * (jax.lax.rsqrt(var + EPS) * gamma) + beta


def alt_block_kernel(pb_ref, pc_ref, wb_ref, wa_ref, wc_ref, bn_ref,
                     mb_ref, mac_ref, o_ref, *, fs1, grid_w,
                     inv_cnt_b, inv_cnt_ac):
    """Fully fused AltBlock: out = relu(a(b(x)) + c(x)), all convs on the MXU."""
    mask_b = mb_ref[...]            # (1, L) valid mask for block b's output grid
    mask_ac = mac_ref[...]          # (1, L) valid mask for blocks a / c output grid
    bn = bn_ref[...]                # (C, 6) = [g_b, b_b, g_a, b_a, g_c, b_c]

    # ---- block c: 5x5 conv (one MXU matmul) + BN (no relu); computed first ----
    acc_c = jnp.dot(wc_ref[...], pc_ref[...], preferred_element_type=jnp.float32)
    z = _bn_train(acc_c, mask_ac, inv_cnt_ac, bn[:, 4:5], bn[:, 5:6])

    # ---- block b: 3x3 conv (one MXU matmul) + BN (no relu) ----
    acc_b = jnp.dot(wb_ref[...], pb_ref[...], preferred_element_type=jnp.float32)
    u = _bn_train(acc_b, mask_b, inv_cnt_b, bn[:, 0:1], bn[:, 1:2])

    # ---- block a: im2col of u via pure lane shifts on the shared W grid, then matmul ----
    rows = []
    for kh in range(fs1):
        for kw in range(fs1):
            s = kh * grid_w + kw
            rows.append(u if s == 0 else jnp.roll(u, -s, axis=-1))
    pa = jnp.concatenate(rows, axis=0)                                  # (fs1*fs1*C, L)
    acc_a = jnp.dot(wa_ref[...], pa, preferred_element_type=jnp.float32)
    y = _bn_train(acc_a, mask_ac, inv_cnt_ac, bn[:, 2:3], bn[:, 3:4])
    y = jnp.maximum(y, 0.0)                                             # block a ReLU

    # ---- residual add + final ReLU; lane-dense, unmasked full-width store ----
    o_ref[...] = jnp.maximum(y + z, 0.0)


# --------------------------------- wrapper ----------------------------------
def _im2col_rows(x_flat, k, w_grid):
    """(C, N*H*W) -> (k*k*C, N*H*W) tap rows on the uncompacted grid.

    Row order is (kh, kw) outer, channel inner; invalid positions hold junk."""
    rows = []
    for kh in range(k):
        for kw in range(k):
            s = kh * w_grid + kw
            rows.append(x_flat if s == 0 else jnp.roll(x_flat, -s, axis=-1))
    return jnp.concatenate(rows, axis=0)


def _pack_weights(w):
    """(O, I, KH, KW) -> (O, KH*KW*I) matching the (kh, kw, ci) tap-row order."""
    o, i, kh, kw = w.shape
    return w.transpose(2, 3, 1, 0).reshape(kh * kw * i, o).T


@jax.jit
def alt_block(x, params_a, params_b, params_c):
    n, c, h, w = x.shape
    fs1 = params_a[0].shape[-1]
    fs2 = params_c[0].shape[-1]
    assert fs2 == 2 * fs1 - 1, "residual shapes only match when fs2 == 2*fs1 - 1"
    ho = h - 2 * (fs1 - 1)
    wo = w - 2 * (fs1 - 1)
    l = n * h * w

    # Lane-dense input presentation: (C, N*H*W), column index = n*H*W + hh*W + ww.
    x_flat = x.astype(jnp.float32).transpose(1, 0, 2, 3).reshape(c, l)
    pb = _im2col_rows(x_flat, fs1, w)         # (fs1*fs1*C, L) patches for block b
    pc = _im2col_rows(x_flat, fs2, w)         # (fs2*fs2*C, L) patches for block c

    wb_m = _pack_weights(params_b[0].astype(jnp.float32))   # (C, fs1*fs1*C)
    wa_m = _pack_weights(params_a[0].astype(jnp.float32))   # (C, fs1*fs1*C)
    wc_m = _pack_weights(params_c[0].astype(jnp.float32))   # (C, fs2*fs2*C)

    # Conv biases (params_*[1]) are intentionally unused: a per-channel constant
    # bias is a mathematical no-op under training-mode BatchNorm.
    bn = jnp.stack([params_b[2], params_b[3], params_a[2], params_a[3],
                    params_c[2], params_c[3]], axis=1).astype(jnp.float32)  # (C, 6)

    # Validity masks on the shared uncompacted grid.
    hw = jnp.arange(h * w)
    hh, ww = hw // w, hw % w
    hb, wbv = h - fs1 + 1, w - fs1 + 1
    mask_b = jnp.tile(((hh < hb) & (ww < wbv)).astype(jnp.float32), n)[None, :]
    mask_ac = jnp.tile(((hh < ho) & (ww < wo)).astype(jnp.float32), n)[None, :]

    kernel = functools.partial(
        alt_block_kernel, fs1=fs1, grid_w=w,
        inv_cnt_b=1.0 / float(n * hb * wbv),
        inv_cnt_ac=1.0 / float(n * ho * wo))

    vmem = pl.BlockSpec(memory_space=pltpu.MemorySpace.VMEM)
    out_flat = pl.pallas_call(
        kernel,
        out_shape=jax.ShapeDtypeStruct((c, l), jnp.float32),
        in_specs=[vmem] * 8,
        out_specs=vmem,
    )(pb, pc, wb_m, wa_m, wc_m, bn, mask_b, mask_ac)

    # Wrapper-side layout plumbing back to NCHW; the valid 12x12 region is top-left.
    return out_flat.reshape(c, n, h, w)[:, :, :ho, :wo].transpose(1, 0, 2, 3)


# ----------------------- float64 numpy reference -----------------------
def _np_block(x, w, b, gamma, beta, relu):
    n, _, h, w_sp = x.shape
    o, i, kh, kw = w.shape
    ho, wo = h - kh + 1, w_sp - kw + 1
    acc = np.zeros((n, o, ho, wo), np.float64)
    for dh in range(kh):
        for dw in range(kw):
            acc += np.einsum('oi,nihw->nohw', w[:, :, dh, dw],
                             x[:, :, dh:dh + ho, dw:dw + wo])
    acc += b[None, :, None, None]
    mean = acc.mean(axis=(0, 2, 3), keepdims=True)
    var = acc.var(axis=(0, 2, 3), keepdims=True)     # biased, as BN training mode
    y = (acc - mean) / np.sqrt(var + EPS)
    y = y * gamma[None, :, None, None] + beta[None, :, None, None]
    return np.maximum(y, 0.0) if relu else y


def np_alt_block(x, pa, pb, pc):
    u = _np_block(x, *pb, relu=False)
    y = _np_block(u, *pa, relu=True)
    z = _np_block(x, *pc, relu=False)
    return np.maximum(y + z, 0.0)


def init_block_params(key, c, fs):
    kw, kb, kg, kbt = jax.random.split(key, 4)
    fan_in = c * fs * fs
    w = jax.random.normal(kw, (c, c, fs, fs), jnp.float32) / jnp.sqrt(fan_in)
    b = 0.1 * jax.random.normal(kb, (c,), jnp.float32)
    gamma = 1.0 + 0.1 * jax.random.normal(kg, (c,), jnp.float32)
    beta = 0.1 * jax.random.normal(kbt, (c,), jnp.float32)
    return (w, b, gamma, beta)


if __name__ == "__main__":
    # AltBlock(nc=4, fs1=3, fs2=5): residual shapes match since fs2 == 2*fs1 - 1.
    N, NC, H, W = 2, 4, 16, 16
    FS1, FS2 = 3, 5

    key = jax.random.PRNGKey(0)
    kx, ka, kb, kc = jax.random.split(key, 4)
    x = jax.random.normal(kx, (N, NC, H, W), jnp.float32)

    params_a = init_block_params(ka, NC, FS1)
    params_b = init_block_params(kb, NC, FS1)
    params_c = init_block_params(kc, NC, FS2)

    out = jax.block_until_ready(alt_block(x, params_a, params_b, params_c))

    to64 = lambda t: tuple(np.asarray(a, np.float64) for a in t)
    ref = np_alt_block(np.asarray(x, np.float64),
                       to64(params_a), to64(params_b), to64(params_c))

    assert out.shape == (N, NC, H - 2 * (FS1 - 1), W - 2 * (FS1 - 1))
    err = float(np.max(np.abs(np.asarray(out, np.float64) - ref)))
    # Loose bound tolerates reduced-precision MXU passes for f32 matmuls at default
    # precision; structural errors (wrong shift / mask / tap order) would be O(1).
    if err > 3e-2:
        raise AssertionError(
            f"Pallas AltBlock mismatch vs float64 reference: max|diff|={err:.3e}")

    print("KERNEL_OK")
</pallas_src>

<mosaic_0001>
module attributes {stable_mosaic.version = 11 : i64} {
  func.func @alt_block_kernel(%arg0: memref<36x512xf32, #tpu.memory_space<vmem>>, %arg1: memref<100x512xf32, #tpu.memory_space<vmem>>, %arg2: memref<4x36xf32, #tpu.memory_space<vmem>>, %arg3: memref<4x36xf32, #tpu.memory_space<vmem>>, %arg4: memref<4x100xf32, #tpu.memory_space<vmem>>, %arg5: memref<4x6xf32, #tpu.memory_space<vmem>>, %arg6: memref<1x512xf32, #tpu.memory_space<vmem>>, %arg7: memref<1x512xf32, #tpu.memory_space<vmem>>, %arg8: memref<4x512xf32, #tpu.memory_space<vmem>>) attributes {dimension_semantics = [], scalar_prefetch = 0 : i64, scratch_operands = 0 : i64, tpu.core_type = #tpu.core_type<tc>} {
    %c0 = arith.constant 0 : index
    %c0_0 = arith.constant 0 : index
    %0 = vector.load %arg6[%c0, %c0_0] : memref<1x512xf32, #tpu.memory_space<vmem>>, vector<1x512xf32>
    %c0_1 = arith.constant 0 : index
    %c0_2 = arith.constant 0 : index
    %1 = vector.load %arg7[%c0_1, %c0_2] : memref<1x512xf32, #tpu.memory_space<vmem>>, vector<1x512xf32>
    %c0_3 = arith.constant 0 : index
    %c0_4 = arith.constant 0 : index
    %2 = vector.load %arg5[%c0_3, %c0_4] : memref<4x6xf32, #tpu.memory_space<vmem>>, vector<4x6xf32>
    %c0_5 = arith.constant 0 : index
    %c0_6 = arith.constant 0 : index
    %3 = vector.load %arg4[%c0_5, %c0_6] : memref<4x100xf32, #tpu.memory_space<vmem>>, vector<4x100xf32>
    %c0_7 = arith.constant 0 : index
    %c0_8 = arith.constant 0 : index
    %4 = vector.load %arg1[%c0_7, %c0_8] : memref<100x512xf32, #tpu.memory_space<vmem>>, vector<100x512xf32>
    %cst = arith.constant dense<0.000000e+00> : vector<4x512xf32>
    %5 = tpu.matmul %3, %4, %cst {dimension_numbers = #tpu.dot_dimension_numbers<[1], [0], [0], [1], [0, 0, 1, 1], [], []>} : vector<4x100xf32>, vector<100x512xf32>, vector<4x512xf32> -> vector<4x512xf32>
    %6 = vector.extract_strided_slice %2 {offsets = [0, 4], sizes = [4, 1], strides = [1, 1]} : vector<4x6xf32> to vector<4x1xf32>
    %7 = vector.extract_strided_slice %2 {offsets = [0, 5], sizes = [4, 1], strides = [1, 1]} : vector<4x6xf32> to vector<4x1xf32>
    %8 = vector.broadcast %1 : vector<1x512xf32> to vector<4x512xf32>
    %9 = arith.mulf %5, %8 : vector<4x512xf32>
    %cst_9 = arith.constant dense<0.000000e+00> : vector<4xf32>
    %10 = vector.multi_reduction <add>, %9, %cst_9 [1] : vector<4x512xf32> to vector<4xf32>
    %11 = vector.shape_cast %10 : vector<4xf32> to vector<4x1xf32>
    %cst_10 = arith.constant 0.00347222225 : f32
    %12 = vector.broadcast %cst_10 : f32 to vector<4x1xf32>
    %13 = arith.mulf %11, %12 : vector<4x1xf32>
    %14 = vector.broadcast %13 : vector<4x1xf32> to vector<4x512xf32>
    %15 = arith.subf %5, %14 : vector<4x512xf32>
    %16 = arith.mulf %15, %15 : vector<4x512xf32>
    %17 = vector.broadcast %1 : vector<1x512xf32> to vector<4x512xf32>
    %18 = arith.mulf %16, %17 : vector<4x512xf32>
    %cst_11 = arith.constant dense<0.000000e+00> : vector<4xf32>
    %19 = vector.multi_reduction <add>, %18, %cst_11 [1] : vector<4x512xf32> to vector<4xf32>
    %20 = vector.shape_cast %19 : vector<4xf32> to vector<4x1xf32>
    %cst_12 = arith.constant 0.00347222225 : f32
    %21 = vector.broadcast %cst_12 : f32 to vector<4x1xf32>
    %22 = arith.mulf %20, %21 : vector<4x1xf32>
    %cst_13 = arith.constant 9.99999974E-6 : f32
    %23 = vector.broadcast %cst_13 : f32 to vector<4x1xf32>
    %24 = arith.addf %22, %23 : vector<4x1xf32>
    %25 = math.rsqrt %24 : vector<4x1xf32>
    %26 = arith.mulf %25, %6 : vector<4x1xf32>
    %27 = vector.broadcast %26 : vector<4x1xf32> to vector<4x512xf32>
    %28 = arith.mulf %15, %27 : vector<4x512xf32>
    %29 = vector.broadcast %7 : vector<4x1xf32> to vector<4x512xf32>
    %30 = arith.addf %28, %29 : vector<4x512xf32>
    %c0_14 = arith.constant 0 : index
    %c0_15 = arith.constant 0 : index
    %31 = vector.load %arg2[%c0_14, %c0_15] : memref<4x36xf32, #tpu.memory_space<vmem>>, vector<4x36xf32>
    %c0_16 = arith.constant 0 : index
    %c0_17 = arith.constant 0 : index
    %32 = vector.load %arg0[%c0_16, %c0_17] : memref<36x512xf32, #tpu.memory_space<vmem>>, vector<36x512xf32>
    %cst_18 = arith.constant dense<0.000000e+00> : vector<4x512xf32>
    %33 = tpu.matmul %31, %32, %cst_18 {dimension_numbers = #tpu.dot_dimension_numbers<[1], [0], [0], [1], [0, 0, 1, 1], [], []>} : vector<4x36xf32>, vector<36x512xf32>, vector<4x512xf32> -> vector<4x512xf32>
    %34 = vector.extract_strided_slice %2 {offsets = [0, 0], sizes = [4, 1], strides = [1, 1]} : vector<4x6xf32> to vector<4x1xf32>
    %35 = vector.extract_strided_slice %2 {offsets = [0, 1], sizes = [4, 1], strides = [1, 1]} : vector<4x6xf32> to vector<4x1xf32>
    %36 = vector.broadcast %0 : vector<1x512xf32> to vector<4x512xf32>
    %37 = arith.mulf %33, %36 : vector<4x512xf32>
    %cst_19 = arith.constant dense<0.000000e+00> : vector<4xf32>
    %38 = vector.multi_reduction <add>, %37, %cst_19 [1] : vector<4x512xf32> to vector<4xf32>
    %39 = vector.shape_cast %38 : vector<4xf32> to vector<4x1xf32>
    %cst_20 = arith.constant 0.00255102036 : f32
    %40 = vector.broadcast %cst_20 : f32 to vector<4x1xf32>
    %41 = arith.mulf %39, %40 : vector<4x1xf32>
    %42 = vector.broadcast %41 : vector<4x1xf32> to vector<4x512xf32>
    %43 = arith.subf %33, %42 : vector<4x512xf32>
    %44 = arith.mulf %43, %43 : vector<4x512xf32>
    %45 = vector.broadcast %0 : vector<1x512xf32> to vector<4x512xf32>
    %46 = arith.mulf %44, %45 : vector<4x512xf32>
    %cst_21 = arith.constant dense<0.000000e+00> : vector<4xf32>
    %47 = vector.multi_reduction <add>, %46, %cst_21 [1] : vector<4x512xf32> to vector<4xf32>
    %48 = vector.shape_cast %47 : vector<4xf32> to vector<4x1xf32>
    %cst_22 = arith.constant 0.00255102036 : f32
    %49 = vector.broadcast %cst_22 : f32 to vector<4x1xf32>
    %50 = arith.mulf %48, %49 : vector<4x1xf32>
    %cst_23 = arith.constant 9.99999974E-6 : f32
    %51 = vector.broadcast %cst_23 : f32 to vector<4x1xf32>
    %52 = arith.addf %50, %51 : vector<4x1xf32>
    %53 = math.rsqrt %52 : vector<4x1xf32>
    %54 = arith.mulf %53, %34 : vector<4x1xf32>
    %55 = vector.broadcast %54 : vector<4x1xf32> to vector<4x512xf32>
    %56 = arith.mulf %43, %55 : vector<4x512xf32>
    %57 = vector.broadcast %35 : vector<4x1xf32> to vector<4x512xf32>
    %58 = arith.addf %56, %57 : vector<4x512xf32>
    %59 = vector.extract_strided_slice %58 {offsets = [0, 1], sizes = [4, 511], strides = [1, 1]} : vector<4x512xf32> to vector<4x511xf32>
    %60 = vector.extract_strided_slice %58 {offsets = [0, 0], sizes = [4, 1], strides = [1, 1]} : vector<4x512xf32> to vector<4x1xf32>
    %61 = tpu.concatenate %59, %60 in 1 : vector<4x511xf32>, vector<4x1xf32> -> vector<4x512xf32>
    %62 = vector.extract_strided_slice %58 {offsets = [0, 2], sizes = [4, 510], strides = [1, 1]} : vector<4x512xf32> to vector<4x510xf32>
    %63 = vector.extract_strided_slice %58 {offsets = [0, 0], sizes = [4, 2], strides = [1, 1]} : vector<4x512xf32> to vector<4x2xf32>
    %64 = tpu.concatenate %62, %63 in 1 : vector<4x510xf32>, vector<4x2xf32> -> vector<4x512xf32>
    %65 = vector.extract_strided_slice %58 {offsets = [0, 16], sizes = [4, 496], strides = [1, 1]} : vector<4x512xf32> to vector<4x496xf32>
    %66 = vector.extract_strided_slice %58 {offsets = [0, 0], sizes = [4, 16], strides = [1, 1]} : vector<4x512xf32> to vector<4x16xf32>
    %67 = tpu.concatenate %65, %66 in 1 : vector<4x496xf32>, vector<4x16xf32> -> vector<4x512xf32>
    %68 = vector.extract_strided_slice %58 {offsets = [0, 17], sizes = [4, 495], strides = [1, 1]} : vector<4x512xf32> to vector<4x495xf32>
    %69 = vector.extract_strided_slice %58 {offsets = [0, 0], sizes = [4, 17], strides = [1, 1]} : vector<4x512xf32> to vector<4x17xf32>
    %70 = tpu.concatenate %68, %69 in 1 : vector<4x495xf32>, vector<4x17xf32> -> vector<4x512xf32>
    %71 = vector.extract_strided_slice %58 {offsets = [0, 18], sizes = [4, 494], strides = [1, 1]} : vector<4x512xf32> to vector<4x494xf32>
    %72 = vector.extract_strided_slice %58 {offsets = [0, 0], sizes = [4, 18], strides = [1, 1]} : vector<4x512xf32> to vector<4x18xf32>
    %73 = tpu.concatenate %71, %72 in 1 : vector<4x494xf32>, vector<4x18xf32> -> vector<4x512xf32>
    %74 = vector.extract_strided_slice %58 {offsets = [0, 32], sizes = [4, 480], strides = [1, 1]} : vector<4x512xf32> to vector<4x480xf32>
    %75 = vector.extract_strided_slice %58 {offsets = [0, 0], sizes = [4, 32], strides = [1, 1]} : vector<4x512xf32> to vector<4x32xf32>
    %76 = tpu.concatenate %74, %75 in 1 : vector<4x480xf32>, vector<4x32xf32> -> vector<4x512xf32>
    %77 = vector.extract_strided_slice %58 {offsets = [0, 33], sizes = [4, 479], strides = [1, 1]} : vector<4x512xf32> to vector<4x479xf32>
    %78 = vector.extract_strided_slice %58 {offsets = [0, 0], sizes = [4, 33], strides = [1, 1]} : vector<4x512xf32> to vector<4x33xf32>
    %79 = tpu.concatenate %77, %78 in 1 : vector<4x479xf32>, vector<4x33xf32> -> vector<4x512xf32>
    %80 = vector.extract_strided_slice %58 {offsets = [0, 34], sizes = [4, 478], strides = [1, 1]} : vector<4x512xf32> to vector<4x478xf32>
    %81 = vector.extract_strided_slice %58 {offsets = [0, 0], sizes = [4, 34], strides = [1, 1]} : vector<4x512xf32> to vector<4x34xf32>
    %82 = tpu.concatenate %80, %81 in 1 : vector<4x478xf32>, vector<4x34xf32> -> vector<4x512xf32>
    %83 = tpu.concatenate %58, %61, %64, %67, %70, %73, %76, %79, %82 in 0 : vector<4x512xf32>, vector<4x512xf32>, vector<4x512xf32>, vector<4x512xf32>, vector<4x512xf32>, vector<4x512xf32>, vector<4x512xf32>, vector<4x512xf32>, vector<4x512xf32> -> vector<36x512xf32>
    %c0_24 = arith.constant 0 : index
    %c0_25 = arith.constant 0 : index
    %84 = vector.load %arg3[%c0_24, %c0_25] : memref<4x36xf32, #tpu.memory_space<vmem>>, vector<4x36xf32>
    %cst_26 = arith.constant dense<0.000000e+00> : vector<4x512xf32>
    %85 = tpu.matmul %84, %83, %cst_26 {dimension_numbers = #tpu.dot_dimension_numbers<[1], [0], [0], [1], [0, 0, 1, 1], [], []>} : vector<4x36xf32>, vector<36x512xf32>, vector<4x512xf32> -> vector<4x512xf32>
    %86 = vector.extract_strided_slice %2 {offsets = [0, 2], sizes = [4, 1], strides = [1, 1]} : vector<4x6xf32> to vector<4x1xf32>
    %87 = vector.extract_strided_slice %2 {offsets = [0, 3], sizes = [4, 1], strides = [1, 1]} : vector<4x6xf32> to vector<4x1xf32>
    %88 = vector.broadcast %1 : vector<1x512xf32> to vector<4x512xf32>
    %89 = arith.mulf %85, %88 : vector<4x512xf32>
    %cst_27 = arith.constant dense<0.000000e+00> : vector<4xf32>
    %90 = vector.multi_reduction <add>, %89, %cst_27 [1] : vector<4x512xf32> to vector<4xf32>
    %91 = vector.shape_cast %90 : vector<4xf32> to vector<4x1xf32>
    %cst_28 = arith.constant 0.00347222225 : f32
    %92 = vector.broadcast %cst_28 : f32 to vector<4x1xf32>
    %93 = arith.mulf %91, %92 : vector<4x1xf32>
    %94 = vector.broadcast %93 : vector<4x1xf32> to vector<4x512xf32>
    %95 = arith.subf %85, %94 : vector<4x512xf32>
    %96 = arith.mulf %95, %95 : vector<4x512xf32>
    %97 = vector.broadcast %1 : vector<1x512xf32> to vector<4x512xf32>
    %98 = arith.mulf %96, %97 : vector<4x512xf32>
    %cst_29 = arith.constant dense<0.000000e+00> : vector<4xf32>
    %99 = vector.multi_reduction <add>, %98, %cst_29 [1] : vector<4x512xf32> to vector<4xf32>
    %100 = vector.shape_cast %99 : vector<4xf32> to vector<4x1xf32>
    %cst_30 = arith.constant 0.00347222225 : f32
    %101 = vector.broadcast %cst_30 : f32 to vector<4x1xf32>
    %102 = arith.mulf %100, %101 : vector<4x1xf32>
    %cst_31 = arith.constant 9.99999974E-6 : f32
    %103 = vector.broadcast %cst_31 : f32 to vector<4x1xf32>
    %104 = arith.addf %102, %103 : vector<4x1xf32>
    %105 = math.rsqrt %104 : vector<4x1xf32>
    %106 = arith.mulf %105, %86 : vector<4x1xf32>
    %107 = vector.broadcast %106 : vector<4x1xf32> to vector<4x512xf32>
    %108 = arith.mulf %95, %107 : vector<4x512xf32>
    %109 = vector.broadcast %87 : vector<4x1xf32> to vector<4x512xf32>
    %110 = arith.addf %108, %109 : vector<4x512xf32>
    %cst_32 = arith.constant 0.000000e+00 : f32
    %111 = vector.broadcast %cst_32 : f32 to vector<4x512xf32>
    %112 = arith.maximumf %110, %111 : vector<4x512xf32>
    %113 = arith.addf %112, %30 : vector<4x512xf32>
    %cst_33 = arith.constant 0.000000e+00 : f32
    %114 = vector.broadcast %cst_33 : f32 to vector<4x512xf32>
    %115 = arith.maximumf %113, %114 : vector<4x512xf32>
    %c0_34 = arith.constant 0 : index
    %c0_35 = arith.constant 0 : index
    %116 = vector.load %arg8[%c0_34, %c0_35] : memref<4x512xf32, #tpu.memory_space<vmem>>, vector<4x512xf32>
    tpu.vector_store %arg8[%c0_34, %c0_35], %115 {strides = array<i32>} : memref<4x512xf32, #tpu.memory_space<vmem>>, vector<4x512xf32>,
    return
  }
}

</mosaic_0001>

<bundles_post_ra>
// kernel: alt_block.1
= control target key start
LH: loop header
LB: loop body
LE: loop exit
PB: predicated region body
PF: predicated region fallthrough
CT: control target
= control target key end

     0   :  { %v1196_v3 = vmov 0.0   ;;  %vm89_vm0 = vcmask 1043456   ;;  %vm85_vm1 = vcmask 818176   ;;  %vm343_vm2 = vcmask 293888   ;;  %s1200_s21 = smov 127   ;;  %s1201_s22 = smov 95   ;;  %s1691_s1 = inlined_call_operand.vmem [shape: f32[100,512], index: 1, kind: input, shape index: {}]   ;;  %s1692_s0 = inlined_call_operand.vmem [shape: f32[36,512], index: 0, kind: input, shape index: {}]   ;;  %s1693_s4 = inlined_call_operand.vmem [shape: f32[4,100], index: 4, kind: input, shape index: {}]   ;;  %s1694_s2 = inlined_call_operand.vmem [shape: f32[4,36], index: 2, kind: input, shape index: {}]   ;;  %s1695_s7 = inlined_call_operand.vmem [shape: f32[1,512], index: 7, kind: input, shape index: {}]   ;;  %s1696_s6 = inlined_call_operand.vmem [shape: f32[1,512], index: 6, kind: input, shape index: {}]   ;;  %s1697_s5 = inlined_call_operand.vmem [shape: f32[4,6], index: 5, kind: input, shape index: {}]   ;;  %s1698_s3 = inlined_call_operand.vmem [shape: f32[4,36], index: 3, kind: input, shape index: {}]   ;;  %s1699_s8 = inlined_call_operand.vmem [shape: f32[4,512], index: 8, kind: output, shape index: {}]  }
   0x1   :  { %v34_v0 = vld [vmem:[%s1691_s1 + $0x8] sm:$0xff]  ;;  %v33_v2 = vld [vmem:[%s1691_s1] sm:$0xff]  ;;  %166 = vmatprep.mubr.f32.mxu0 %v1196_v3  ;;  %237 = vmatprep.mubr.f32.mxu1 %v1196_v3  ;;  %v36_v6 = vld [vmem:[%s1691_s1 + $0x18] sm:$0xff]  ;;  %s1202_s23 = smov 96   ;;  %s1203_s24 = smov 126   ;;  %vm590_vm3 = vcmask 1039360  }
   0x2   :  { %v38_v1 = vld [vmem:[%s1691_s1 + $0x28] sm:$0xff]  ;;  %v37_v5 = vld [vmem:[%s1691_s1 + $0x20] sm:$0xff]  ;;  %v40_v7 = vld [vmem:[%s1691_s1 + $0x38] sm:$0xff]  ;;  %s1204_s25 = smov 94   ;;  %s1205_s26 = smov 110   ;;  %vm623_vm4 = vcmask 916480  }
   0x3   :  { %v1018_v4 = vpack.c.bf16 %v38_v1, %v34_v0  ;;  %v1020_v8 = vpack.c.bf16 %v37_v5, %v33_v2  ;;  %v1042_v9 = vpack.c.bf16 %v40_v7, %v36_v6  ;;  %v35_v10 = vld [vmem:[%s1691_s1 + $0x10] sm:$0xff]  ;;  %v42_v12 = vld [vmem:[%s1691_s1 + $0x48] sm:$0xff]  ;;  %v41_v15 = vld [vmem:[%s1691_s1 + $0x40] sm:$0xff]  ;;  %vm605_vm5 = vcmask 1031168  }
   0x4   :  { %v39_v11 = vld [vmem:[%s1691_s1 + $0x30] sm:$0xff]  ;;  %v46_v14 = vld [vmem:[%s1691_s1 + $0x68] sm:$0xff]  ;;  %v45_v16 = vld [vmem:[%s1691_s1 + $0x60] sm:$0xff]  ;;  %vm689_vm6 = vcmask 777216   ;;  %vm656_vm7 = vcmask 900096   ;;  %vm671_vm8 = vcmask 785408  }
   0x5   :  { %1019 = vmatprep.subr.bf16.mxu0 %v1018_v4  ;;  %v1044_v13 = vpack.c.bf16 %v39_v11, %v35_v10  ;;  %1043 = vmatprep.subr.bf16.mxu1 %v1042_v9  ;;  %v1022_v17 = vpack.c.bf16 %v46_v14, %v42_v12  ;;  %v1024_v18 = vpack.c.bf16 %v45_v16, %v41_v15  ;;  %v44_v19 = vld [vmem:[%s1691_s1 + $0x58] sm:$0xff]  ;;  %v43_v21 = vld [vmem:[%s1691_s1 + $0x50] sm:$0xff]  ;;  %v50_v24 = vld [vmem:[%s1691_s1 + $0x88] sm:$0xff]  ;;  %vm638_vm9 = vcmask 908288  }
   0x6   :  { %1021 = vmatpush1.bf16.msra.mxu0 %v1020_v8  ;;  %v48_v20 = vld [vmem:[%s1691_s1 + $0x78] sm:$0xff]  ;;  %v47_v23 = vld [vmem:[%s1691_s1 + $0x70] sm:$0xff]  ;;  %v54_v25 = vld [vmem:[%s1691_s1 + $0xa8] sm:$0xff]  ;;  %vm704_vm10 = vcmask 769024  }
   0x7   :  { %1045 = vmatpush1.bf16.msra.mxu1 %v1044_v13  ;;  %v1046_v22 = vpack.c.bf16 %v48_v20, %v44_v19  ;;  %1023 = vmatprep.subr.bf16.mxu0 %v1022_v17  ;;  %v1048_v26 = vpack.c.bf16 %v47_v23, %v43_v21  ;;  %v1026_v27 = vpack.c.bf16 %v54_v25, %v50_v24  ;;  %v49_v28 = vld [vmem:[%s1691_s1 + $0x80] sm:$0xff]  ;;  %v52_v30 = vld [vmem:[%s1691_s1 + $0x98] sm:$0xff]  ;;  %v51_v32 = vld [vmem:[%s1691_s1 + $0x90] sm:$0xff] }
   0x8   :  { %v53_v29 = vld [vmem:[%s1691_s1 + $0xa0] sm:$0xff]  ;;  %v56_v31 = vld [vmem:[%s1691_s1 + $0xb8] sm:$0xff]  ;;  %v55_v33 = vld [vmem:[%s1691_s1 + $0xb0] sm:$0xff] }
   0x9   :  { %1047 = vmatprep.subr.bf16.mxu1 %v1046_v22  ;;  %v1028_v34 = vpack.c.bf16 %v53_v29, %v49_v28  ;;  %v1050_v35 = vpack.c.bf16 %v56_v31, %v52_v30  ;;  %v58_v36 = vld [vmem:[%s1691_s1 + $0xc8] sm:$0xff]  ;;  %v57_v38 = vld [vmem:[%s1691_s1 + $0xc0] sm:$0xff]  ;;  %v1052_v39 = vpack.c.bf16 %v55_v33, %v51_v32  ;;  %v60_v42 = vld [vmem:[%s1691_s1 + $0xd8] sm:$0xff] }
   0xa   :  { %1025 = vmatpush1.bf16.msra.mxu0 %v1024_v18  ;;  %v62_v37 = vld [vmem:[%s1691_s1 + $0xe8] sm:$0xff]  ;;  %v61_v41 = vld [vmem:[%s1691_s1 + $0xe0] sm:$0xff]  ;;  %v64_v43 = vld [vmem:[%s1691_s1 + $0xf8] sm:$0xff] }
   0xb   :  { %1049 = vmatpush1.bf16.msra.mxu1 %v1048_v26  ;;  %1027 = vmatprep.subr.bf16.mxu0 %v1026_v27  ;;  %v1030_v40 = vpack.c.bf16 %v62_v37, %v58_v36  ;;  %v1054_v44 = vpack.c.bf16 %v64_v43, %v60_v42  ;;  %v59_v45 = vld [vmem:[%s1691_s1 + $0xd0] sm:$0xff]  ;;  %v66_v47 = vld [vmem:[%s1691_s1 + $0x108] sm:$0xff]  ;;  %v1032_v49 = vpack.c.bf16 %v61_v41, %v57_v38  ;;  %v68_v50 = vld [vmem:[%s1691_s1 + $0x118] sm:$0xff] }
   0xc   :  { %1051 = vmatprep.subr.bf16.mxu1 %v1050_v35  ;;  %v63_v46 = vld [vmem:[%s1691_s1 + $0xf0] sm:$0xff]  ;;  %v70_v48 = vld [vmem:[%s1691_s1 + $0x128] sm:$0xff]  ;;  %v72_v51 = vld [vmem:[%s1691_s1 + $0x138] sm:$0xff] }
   0xd   :  { %v1056_v52 = vpack.c.bf16 %v63_v46, %v59_v45  ;;  %v1034_v53 = vpack.c.bf16 %v70_v48, %v66_v47  ;;  %v65_v54 = vld [vmem:[%s1691_s1 + $0x100] sm:$0xff]  ;;  %v67_v56 = vld [vmem:[%s1691_s1 + $0x110] sm:$0xff]  ;;  %v1058_v57 = vpack.c.bf16 %v72_v51, %v68_v50  ;;  %v74_v59 = vld [vmem:[%s1691_s1 + $0x148] sm:$0xff] }
   0xe   :  { %1029 = vmatpush1.bf16.msra.mxu0 %v1028_v34  ;;  %v69_v55 = vld [vmem:[%s1691_s1 + $0x120] sm:$0xff]  ;;  %v71_v58 = vld [vmem:[%s1691_s1 + $0x130] sm:$0xff]  ;;  %v78_v60 = vld [vmem:[%s1691_s1 + $0x168] sm:$0xff] }
   0xf   :  { %1053 = vmatpush1.bf16.msra.mxu1 %v1052_v39  ;;  %1031 = vmatprep.subr.bf16.mxu0 %v1030_v40  ;;  %v76_v61 = vld [vmem:[%s1691_s1 + $0x158] sm:$0xff]  ;;  %v1036_v63 = vpack.c.bf16 %v69_v55, %v65_v54  ;;  %v1060_v0 = vpack.c.bf16 %v71_v58, %v67_v56  ;;  %v1038_v1 = vpack.c.bf16 %v78_v60, %v74_v59  ;;  %v73_v2 = vld [vmem:[%s1691_s1 + $0x140] sm:$0xff]  ;;  %v75_v6 = vld [vmem:[%s1691_s1 + $0x150] sm:$0xff] }
  0x10   :  { %1055 = vmatprep.subr.bf16.mxu1 %v1054_v44  ;;  %v80_v62 = vld [vmem:[%s1691_s1 + $0x178] sm:$0xff]  ;;  %v77_v4 = vld [vmem:[%s1691_s1 + $0x160] sm:$0xff]  ;;  %v79_v7 = vld [vmem:[%s1691_s1 + $0x170] sm:$0xff]  ;;  %v245_v44 = vlaneseq }
  0x11   :  { %v1062_v5 = vpack.c.bf16 %v80_v62, %v76_v61  ;;  %v1040_v8 = vpack.c.bf16 %v77_v4, %v73_v2  ;;  %v1064_v9 = vpack.c.bf16 %v79_v7, %v75_v6  ;;  %v82_v10 = vld [vmem:[%s1691_s1 + $0x188] sm:$0xf]  ;;  %v81_v13 = vld [vmem:[%s1691_s1 + $0x180] sm:$0xf]  ;;  %v84_v14 = vld [vmem:[%s1691_s1 + $0x198] sm:$0xf] }
  0x12   :  { %1033 = vmatpush1.bf16.msra.mxu0 %v1032_v49  ;;  %v324_v11 = vld [vmem:[%s1692_s0 + $0x8] sm:$0xff]  ;;  %v323_v15 = vld [vmem:[%s1692_s0] sm:$0xff]  ;;  %v326_v17 = vld [vmem:[%s1692_s0 + $0x18] sm:$0xff]  ;;  %v246_v45 = vshrl.u32 %v245_v44, 7 }
  0x13   :  { %1057 = vmatpush1.bf16.msra.mxu1 %v1056_v52  ;;  %1035 = vmatprep.subr.bf16.mxu0 %v1034_v53  ;;  %v328_v12 = vld [vmem:[%s1692_s0 + $0x28] sm:$0xff]  ;;  %v327_v16 = vld [vmem:[%s1692_s0 + $0x20] sm:$0xff]  ;;  %v330_v18 = vld [vmem:[%s1692_s0 + $0x38] sm:$0xff] }
  0x14   :  { %1059 = vmatprep.subr.bf16.mxu1 %v1058_v57  ;;  %v325_v19 = vld [vmem:[%s1692_s0 + $0x10] sm:$0xff]  ;;  %v1066_v20 = vpack.c.bf16 %v328_v12, %v324_v11  ;;  %v332_v22 = vld [vmem:[%s1692_s0 + $0x48] sm:$0xff]  ;;  %v32_v24 = vld [vmem:[%s1693_s4] sm:$0xf]  ;;  %v1068_v25 = vpack.c.bf16 %v327_v16, %v323_v15  ;;  %v1074_v29 = vpack.c.bf16 %v330_v18, %v326_v17  ;;  %v247_v46 = vsub.s32 0, %v246_v45  ;;  %s1206_s4 = smov 111  }
  0x15   :  { %v329_v21 = vld [vmem:[%s1692_s0 + $0x30] sm:$0xff]  ;;  %v336_v23 = vld [vmem:[%s1692_s0 + $0x68] sm:$0xff]  ;;  %v334_v26 = vld [vmem:[%s1692_s0 + $0x58] sm:$0xff]  ;;  %v251_v48 = vsub.s32 1, %v246_v45  ;;  %v255_v49 = vsub.s32 2, %v246_v45  ;;  %v259_v50 = vsub.s32 3, %v246_v45 }
  0x16   :  { %1037 = vmatpush1.bf16.msra.mxu0 %v1036_v63  ;;  %v338_v27 = vld [vmem:[%s1692_s0 + $0x78] sm:$0xff]  ;;  %v83_v28 = vld [vmem:[%s1691_s1 + $0x190] sm:$0xf]  ;;  %v331_v30 = vld [vmem:[%s1692_s0 + $0x40] sm:$0xff]  ;;  %v1076_v32 = vpack.c.bf16 %v329_v21, %v325_v19  ;;  %v1070_v33 = vpack.c.bf16 %v336_v23, %v332_v22 }
  0x17   :  { %1061 = vmatpush1.bf16.msra.mxu1 %v1060_v0  ;;  %1039 = vmatprep.subr.bf16.mxu0 %v1038_v1  ;;  %v335_v31 = vld [vmem:[%s1692_s0 + $0x60] sm:$0xff]  ;;  %v1078_v34 = vpack.c.bf16 %v338_v27, %v334_v26  ;;  %v333_v35 = vld [vmem:[%s1692_s0 + $0x50] sm:$0xff]  ;;  %v340_v39 = vld [vmem:[%s1692_s0 + $0x88] sm:$0xf] }
  0x18   :  { %1063 = vmatprep.subr.bf16.mxu1 %v1062_v5  ;;  %v337_v36 = vld [vmem:[%s1692_s0 + $0x70] sm:$0xff]  ;;  %v1072_v37 = vpack.c.bf16 %v335_v31, %v331_v30  ;;  %v342_v40 = vld [vmem:[%s1692_s0 + $0x98] sm:$0xf]  ;;  %v339_v41 = vld [vmem:[%s1692_s0 + $0x80] sm:$0xf] }
  0x19   :  { %v1080_v38 = vpack.c.bf16 %v337_v36, %v333_v35  ;;  %v322_v42 = vld [vmem:[%s1694_s2] sm:$0xf]  ;;  %v341_v43 = vld [vmem:[%s1692_s0 + $0x90] sm:$0xf] }
  0x1a   :  { %1041 = vmatpush1.bf16.msra.mxu0 %v1040_v8  ;;  %v30_v47 = vld [vmem:[%s1695_s7] sm:$0xf] }
  0x1b   :  { %1065 = vmatpush1.bf16.msra.mxu1 %v1064_v9  ;;  %1000 = vmatprep.subr.msk.mxu0 %vm89_vm0, %v82_v10  ;;  %v1499_v51 = vrot.slane %v30_v47, %v247_v46  ;;  %v1501_v52 = vrot.slane %v30_v47, %v251_v48  ;;  %v1503_v53 = vrot.slane %v30_v47, %v255_v49  ;;  %v29_v0 = vld [vmem:[%s1696_s6] sm:$0xf] }
  0x1c   :  { %1003 = vmatprep.subr.msk.mxu1 %vm89_vm0, %v84_v14  ;;  %v1507_v55 = vrot.slane %v30_v47, %v259_v50  ;;  %v505_v5 = vrot.slane %v29_v0, %v247_v46  ;;  %v509_v7 = vrot.slane %v29_v0, %v251_v48  ;;  %v513_v8 = vrot.slane %v29_v0, %v255_v49 }
  0x1d   :  { %v517_v11 = vrot.slane %v29_v0, %v259_v50  ;;  %v1197_v47 = vmov 0  }
  0x1e   :  { %1001 = vmatpush1.msk.msra.mxu0 %vm89_vm0, %v81_v13  ;;  %1113 = vset.pattern.permute.xlu1 %v1197_v47 }
  0x1f   :  { %1002 = vmatmul.mubr.msk.f32.vlgmr.msra.gmra.mrb[0].mxu0 %vm85_vm1, %v32_v24  ;;  %1067 = vmatprep.subr.bf16.mxu0 %v1066_v20 }
  0x20   :  { %1004 = vmatpush1.msk.msra.mxu1 %vm89_vm0, %v83_v28  ;;  %1069 = vmatpush1.bf16.msra.mxu0 %v1068_v25 }
  0x21   :  { %1075 = vmatprep.subr.bf16.mxu1 %v1074_v29  ;;  %1005 = vmatmul.mubr.msk.f32.vlgmr.msra.gmra.mrb[0].mxu1 %vm85_vm1, %v32_v24 }
  0x22   :  { %1077 = vmatpush1.bf16.msra.mxu1 %v1076_v32  ;;  %1071 = vmatprep.subr.bf16.mxu0 %v1070_v33 }
  0x23   :  { %1079 = vmatprep.subr.bf16.mxu1 %v1078_v34  ;;  %423 = vmatprep.mubr.f32.mxu0 %v1196_v3 }
  0x24   :  { %1073 = vmatpush1.bf16.msra.mxu0 %v1072_v37  ;;  %494 = vmatprep.mubr.f32.mxu1 %v1196_v3 }
  0x25   :  { %1006 = vmatprep.subr.msk.mxu0 %vm89_vm0, %v340_v39 }
  0x26   :  { %1081 = vmatpush1.bf16.msra.mxu1 %v1080_v38 }
  0x27   :  { %1009 = vmatprep.subr.msk.mxu1 %vm89_vm0, %v342_v40 }
  0x28   :  { %1007 = vmatpush1.msk.msra.mxu0 %vm89_vm0, %v339_v41 }
  0x29   :  { %1008 = vmatmul.mubr.msk.f32.vlgmr.msra.gmra.mrb[2].mxu0 %vm343_vm2, %v322_v42 }
  0x2a   :  { %1010 = vmatpush1.msk.msra.mxu1 %vm89_vm0, %v341_v43  ;;  %840 = vmatprep.mubr.f32.mxu0 %v1196_v3 }
  0x2b   :  { %1011 = vmatmul.mubr.msk.f32.vlgmr.msra.gmra.mrb[2].mxu1 %vm343_vm2, %v322_v42 }
  0x2c   :  { %911 = vmatprep.mubr.f32.mxu1 %v1196_v3 }
  0xf2   :  { %v1505_v54 = vpop.f32.mrb[0].mxu0 }
  0xf3   :  { %v265_v3 = vmul.f32 %v1499_v51, %v1505_v54  ;;  %v1511_v56 = vpop.f32.mrb[1].mxu0 }
  0xf4   :  { %v266_v57 = vmul.f32 %v1501_v52, %v1511_v56  ;;  %v1515_v58 = vpop.f32.mrb[0].mxu1 }
  0xf5   :  { %v269_v59 = vsel %vm89_vm0, %v265_v3, 0.0  ;;  %v267_v60 = vmul.f32 %v1503_v53, %v1515_v58  ;;  %v1520_v61 = vpop.f32.mrb[1].mxu1  ;;  %v1543_v3 = vld [vmem:[%s1697_s5] sm:$0xf]  ;;  %s1199_s5 = smov 112  }
  0xf6   :  { %v270_v62 = vsel %vm89_vm0, %v266_v57, 0.0  ;;  %v268_v63 = vmul.f32 %v1507_v55, %v1520_v61 }
  0xf7   :  { %v271_v1 = vadd.f32 %v270_v62, %v269_v59  ;;  %v272_v2 = vsel %vm89_vm0, %v267_v60, 0.0  ;;  %v1198_v60 = vmov 1  }
  0xf8   :  { %v274_v4 = vsel %vm89_vm0, %v268_v63, 0.0 }
  0xf9   :  { %v273_v6 = vadd.f32 %v272_v2, %v271_v1 }
  0xfb   :  { %v1530_v9 = vadd.f32 %v274_v4, %v273_v6 }
  0xfc   :  { %v425_v10 = vpop.f32.mrb[2].mxu0 }
  0xfd   :  { %v522_v12 = vmul.f32 %v505_v5, %v425_v10  ;;  %v427_v13 = vpop.f32.mrb[3].mxu0 }
  0xfe   :  { %v523_v14 = vmul.f32 %v509_v7, %v427_v13  ;;  %v496_v15 = vpop.f32.mrb[2].mxu1 }
  0xff   :  { %v526_v16 = vsel %vm89_vm0, %v522_v12, 0.0  ;;  %v524_v17 = vmul.f32 %v513_v8, %v496_v15  ;;  %v498_v18 = vpop.f32.mrb[3].mxu1 }
 0x100   :  { %v527_v19 = vsel %vm89_vm0, %v523_v14, 0.0  ;;  %v525_v20 = vmul.f32 %v517_v11, %v498_v18 }
 0x101   :  { %v528_v21 = vadd.f32 %v527_v19, %v526_v16  ;;  %v529_v22 = vsel %vm89_vm0, %v524_v17, 0.0 }
 0x102   :  { %v531_v24 = vsel %vm89_vm0, %v525_v20, 0.0 }
 0x103   :  { %v530_v23 = vadd.f32 %v529_v22, %v528_v21 }
 0x105   :  { %v532_v25 = vadd.f32 %v531_v24, %v530_v23 }
 0x107   :  { %533 = vadd.xlane.f32.xlu0 %v532_v25 }
 0x194   :  { %v534_v26 = vpop.xlane.xlu0 %533 }
 0x195   :  { %v535_v27 = vmul.f32 0.0025510204, %v534_v26 }
 0x197   :  { %v536_v28 = vsub.f32 %v425_v10, %v535_v27  ;;  %v537_v29 = vsub.f32 %v427_v13, %v535_v27  ;;  %v538_v30 = vsub.f32 %v496_v15, %v535_v27  ;;  %v539_v31 = vsub.f32 %v498_v18, %v535_v27 }
 0x199   :  { %v540_v32 = vmul.f32 %v536_v28, %v536_v28  ;;  %v541_v33 = vmul.f32 %v537_v29, %v537_v29  ;;  %v542_v34 = vmul.f32 %v538_v30, %v538_v30  ;;  %v543_v35 = vmul.f32 %v539_v31, %v539_v31 }
 0x19b   :  { %v544_v36 = vmul.f32 %v540_v32, %v505_v5  ;;  %v545_v37 = vmul.f32 %v541_v33, %v509_v7  ;;  %v546_v38 = vmul.f32 %v542_v34, %v513_v8  ;;  %v547_v39 = vmul.f32 %v543_v35, %v517_v11 }
 0x19d   :  { %v548_v40 = vsel %vm89_vm0, %v544_v36, 0.0  ;;  %v549_v41 = vsel %vm89_vm0, %v545_v37, 0.0  ;;  %v551_v43 = vsel %vm89_vm0, %v546_v38, 0.0  ;;  %v553_v45 = vsel %vm89_vm0, %v547_v39, 0.0 }
 0x19e   :  { %v550_v42 = vadd.f32 %v549_v41, %v548_v40 }
 0x1a0   :  { %v552_v44 = vadd.f32 %v551_v43, %v550_v42 }
 0x1a2   :  { %v554_v46 = vadd.f32 %v553_v45, %v552_v44 }
 0x1a4   :  { %555 = vadd.xlane.f32.xlu0 %v554_v46 }
 0x231   :  { %v556_v48 = vpop.xlane.xlu0 %555 }
 0x232   :  { %v557_v49 = vmul.f32 0.0025510204, %v556_v48 }
 0x234   :  { %v558_v50 = vadd.f32 1e-05, %v557_v49 }
 0x236   :  { %1190 = vrsqrt.f32 %v558_v50 }
 0x240   :  { %v1191_v57 = vpop.eup %1190 }
 0x241   :  { %v560_v59 = vmul.f32 %v1191_v57, %v1543_v3 }
 0x243   :  { %563 = vperm.xlu1 %1113, %v560_v59  }
 0x247   :  { %1114 = vset.pattern.permute.xlu1 %v1198_v60 }
 0x248   :  { %571 = vperm.xlu1 %1114, %v1543_v3  }
 0x2c2   :  { %v564_v62 = vpop.permute.xlu1 %563 }
 0x2c3   :  { %v567_v63 = vmul.f32 %v564_v62, %v537_v29  ;;  %v568_v0 = vmul.f32 %v564_v62, %v538_v30  ;;  %v566_v2 = vmul.f32 %v564_v62, %v536_v28  ;;  %v569_v4 = vmul.f32 %v564_v62, %v539_v31 }
 0x2c7   :  { %v572_v1 = vpop.permute.xlu1 %571 }
 0x2c8   :  { %v1547_v5 = vadd.f32 %v572_v1, %v567_v63  ;;  %v1549_v6 = vadd.f32 %v572_v1, %v568_v0  ;;  %v1551_v7 = vadd.f32 %v572_v1, %v566_v2  ;;  %v1553_v8 = vadd.f32 %v572_v1, %v569_v4 }
 0x2ca   :  { %v1120_v10 = vpack.i.bf16 %v1549_v6, %v1547_v5  ;;  %v1125_v11 = vpack.i.bf16 %v1553_v8, %v1551_v7 }
 0x2cc   :  { %1121 = vrot.lane.b32.xlu1 %v1120_v10, %s1199_s5  ;;  %1116 = vrot.lane.b32.xlu0 %v1120_v10, %s1200_s21 }
 0x2d0   :  { %1151 = vrot.lane.b32.xlu0 %v1120_v10, %s1201_s22  ;;  %1126 = vrot.lane.b32.xlu1 %v1125_v11, %s1200_s21 }
 0x2d4   :  { %1161 = vrot.lane.b32.xlu0 %v1125_v11, %s1201_s22  ;;  %1131 = vrot.lane.b32.xlu1 %v1125_v11, %s1199_s5 }
 0x2d8   :  { %1171 = vrot.lane.b32.xlu0 %v1120_v10, %s1202_s23  ;;  %1136 = vrot.lane.b32.xlu1 %v1120_v10, %s1203_s24 }
 0x2dc   :  { %1181 = vrot.lane.b32.xlu0 %v1125_v11, %s1202_s23  ;;  %1141 = vrot.lane.b32.xlu1 %v1125_v11, %s1203_s24 }
 0x2e0   :  { %700 = vrot.lane.b32.xlu0 %v1549_v6, %s1204_s25  ;;  %1146 = vrot.lane.b32.xlu1 %v1120_v10, %s1205_s26 }
 0x2e4   :  { %702 = vrot.lane.b32.xlu0 %v1553_v8, %s1204_s25  ;;  %1156 = vrot.lane.b32.xlu1 %v1125_v11, %s1205_s26 }
 0x2e8   :  { %1166 = vrot.lane.b32.xlu1 %v1120_v10, %s1206_s4 }
 0x2ec   :  { %1176 = vrot.lane.b32.xlu1 %v1125_v11, %s1206_s4 }
 0x2f0   :  { %698 = vrot.lane.b32.xlu1 %v1547_v5, %s1204_s25 }
 0x2f4   :  { %696 = vrot.lane.b32.xlu1 %v1551_v7, %s1204_s25 }
 0x303   :  { %276 = vadd.xlane.f32.xlu0 %v1530_v9 }
 0x33e   :  { %v1122_v12 = vpop.permute.xlu1 %1121  ;;  %v1117_v13 = vpop.permute.xlu0 %1116 }
 0x33f   :  { %v1119_v16 = vunpack.i.h.bf16 %v1117_v13  ;;  %v1118_v17 = vunpack.i.l.bf16 %v1117_v13  ;;  %v1124_v20 = vunpack.i.h.bf16 %v1122_v12  ;;  %v1123_v21 = vunpack.i.l.bf16 %v1122_v12 }
 0x341   :  { %v592_v23 = vsel %vm590_vm3, %v1118_v17, %v1119_v16  ;;  %v625_v28 = vsel %vm623_vm4, %v1123_v21, %v1124_v20 }
 0x342   :  { %v1127_v14 = vpop.permute.xlu1 %1126  ;;  %v1564_v15 = vpop.permute.xlu0 %1151  ;;  %v713_v29 = vrot.slane %v592_v23, 4  ;;  %v722_v36 = vrot.slane %v625_v28, 4 }
 0x343   :  { %v1128_v18 = vunpack.i.l.bf16 %v1127_v14  ;;  %v1129_v22 = vunpack.i.h.bf16 %v1127_v14  ;;  %v1154_v41 = vunpack.i.h.bf16 %v1564_v15  ;;  %v1153_v4 = vunpack.i.l.bf16 %v1564_v15 }
 0x344   :  { %v748_v48 = vsel %vm89_vm0, %v1547_v5, %v713_v29 }
 0x345   :  { %v591_v9 = vsel %vm590_vm3, %v1128_v18, %v1118_v17  ;;  %v596_v30 = vsel %vm590_vm3, %v1129_v22, %v1128_v18  ;;  %v593_v33 = vsel %vm590_vm3, %v1119_v16, %v1129_v22 }
 0x346   :  { %v1132_v19 = vpop.permute.xlu1 %1131  ;;  %v1567_v24 = vpop.permute.xlu0 %1161  ;;  %v712_v34 = vrot.slane %v591_v9, 4  ;;  %v715_v42 = vrot.slane %v596_v30, 4  ;;  %v714_v46 = vrot.slane %v593_v33, 4 }
 0x347   :  { %v1133_v25 = vunpack.i.l.bf16 %v1132_v19  ;;  %v1134_v26 = vunpack.i.h.bf16 %v1132_v19  ;;  %v1164_v12 = vunpack.i.h.bf16 %v1567_v24  ;;  %v1163_v16 = vunpack.i.l.bf16 %v1567_v24 }
 0x348   :  { %v747_v60 = vsel %vm89_vm0, %v1551_v7, %v712_v34  ;;  %v750_v10 = vsel %vm89_vm0, %v1553_v8, %v715_v42  ;;  %v749_v13 = vsel %vm89_vm0, %v1549_v6, %v714_v46 }
 0x349   :  { %v624_v35 = vsel %vm623_vm4, %v1133_v25, %v1123_v21  ;;  %v626_v37 = vsel %vm623_vm4, %v1124_v20, %v1134_v26  ;;  %v629_v38 = vsel %vm623_vm4, %v1134_v26, %v1133_v25  ;;  %v691_v20 = vsel %vm689_vm6, %v1153_v4, %v1154_v41 }
 0x34a   :  { %v1137_v27 = vpop.permute.xlu1 %1136  ;;  %v1578_v43 = vpop.permute.xlu0 %1171  ;;  %v721_v47 = vrot.slane %v624_v35, 4  ;;  %v723_v50 = vrot.slane %v626_v37, 4  ;;  %v724_v57 = vrot.slane %v629_v38, 4  ;;  %v692_v6 = vsel %vm689_vm6, %v1154_v41, %v1164_v12 }
 0x34b   :  { %v1139_v31 = vunpack.i.h.bf16 %v1137_v27  ;;  %v1138_v32 = vunpack.i.l.bf16 %v1137_v27  ;;  %v1174_v21 = vunpack.i.h.bf16 %v1578_v43  ;;  %v1173_v22 = vunpack.i.l.bf16 %v1578_v43 }
 0x34c   :  { %v690_v24 = vsel %vm689_vm6, %v1163_v16, %v1153_v4  ;;  %v740_v27 = vrot.slane %v691_v20, 4  ;;  %v695_v30 = vsel %vm689_vm6, %v1164_v12, %v1163_v16  ;;  %v741_v34 = vrot.slane %v692_v6, 4  ;;  %v763_v20 = vld [vmem:[%s1698_s3] sm:$0xf] }
 0x34d   :  { %v607_v39 = vsel %vm605_vm5, %v1138_v32, %v1139_v31  ;;  %v739_v35 = vrot.slane %v690_v24, 4  ;;  %v742_v42 = vrot.slane %v695_v30, 4 }
 0x34e   :  { %v1142_v40 = vpop.permute.xlu1 %1141  ;;  %v752_v49 = vsel %vm89_vm0, %v607_v39, %v722_v36  ;;  %v1182_v17 = vpop.permute.xlu0 %1181 }
 0x34f   :  { %v1144_v44 = vunpack.i.h.bf16 %v1142_v40  ;;  %v1143_v45 = vunpack.i.l.bf16 %v1142_v40  ;;  %v1082_v0 = vpack.c.bf16 %v752_v49, %v748_v48  ;;  %v1183_v23 = vunpack.i.l.bf16 %v1182_v17 }
 0x350   :  { %v1184_v28 = vunpack.i.h.bf16 %v1182_v17 }
 0x351   :  { %v606_v59 = vsel %vm605_vm5, %v1143_v45, %v1138_v32  ;;  %v608_v62 = vsel %vm605_vm5, %v1139_v31, %v1144_v44  ;;  %v614_v63 = vsel %vm605_vm5, %v1144_v44, %v1143_v45  ;;  %1083 = vmatprep.subr.bf16.mxu0 %v1082_v0  ;;  %v673_v31 = vsel %vm671_vm8, %v1173_v22, %v1174_v21 }
 0x352   :  { %v1147_v1 = vpop.permute.xlu1 %1146  ;;  %v751_v2 = vsel %vm89_vm0, %v606_v59, %v721_v47  ;;  %v754_v11 = vsel %vm89_vm0, %v614_v63, %v724_v57  ;;  %v753_v14 = vsel %vm89_vm0, %v608_v62, %v723_v50  ;;  %v672_v36 = vsel %vm671_vm8, %v1183_v23, %v1173_v22  ;;  %v701_v57 = vpop.permute.xlu0 %700 }
 0x353   :  { %v1084_v5 = vpack.c.bf16 %v751_v2, %v747_v60  ;;  %v1090_v7 = vpack.c.bf16 %v754_v11, %v750_v10  ;;  %v1149_v18 = vunpack.i.h.bf16 %v1147_v1  ;;  %v1148_v15 = vunpack.i.l.bf16 %v1147_v1 }
 0x354   :  { %v1092_v19 = vpack.c.bf16 %v753_v14, %v749_v13  ;;  %v680_v43 = vsel %vm671_vm8, %v1184_v28, %v1183_v23  ;;  %v760_v46 = vsel %vm89_vm0, %v673_v31, %v740_v27  ;;  %v674_v47 = vsel %vm671_vm8, %v1174_v21, %v1184_v28 }
 0x355   :  { %1085 = vmatpush1.bf16.msra.mxu0 %v1084_v5  ;;  %1091 = vmatprep.subr.bf16.mxu1 %v1090_v7  ;;  %v658_v25 = vsel %vm656_vm7, %v1148_v15, %v1149_v18  ;;  %v759_v63 = vsel %vm89_vm0, %v672_v36, %v739_v35  ;;  %v762_v4 = vsel %vm89_vm0, %v680_v43, %v742_v42 }
 0x356   :  { %v1157_v8 = vpop.permute.xlu1 %1156  ;;  %1093 = vmatpush1.bf16.msra.mxu1 %v1092_v19  ;;  %v731_v37 = vrot.slane %v658_v25, 4  ;;  %v761_v7 = vsel %vm89_vm0, %v674_v47, %v741_v34 }
 0x357   :  { %v1159_v9 = vunpack.i.h.bf16 %v1157_v8  ;;  %v1158_v26 = vunpack.i.l.bf16 %v1157_v8 }
 0x359   :  { %v657_v38 = vsel %vm656_vm7, %v1158_v26, %v1148_v15  ;;  %v659_v39 = vsel %vm656_vm7, %v1149_v18, %v1159_v9  ;;  %v662_v40 = vsel %vm656_vm7, %v1159_v9, %v1158_v26  ;;  %v703_v18 = vpop.permute.xlu0 %702 }
 0x35a   :  { %v1167_v29 = vpop.permute.xlu1 %1166  ;;  %v730_v59 = vrot.slane %v657_v38, 4  ;;  %v732_v60 = vrot.slane %v659_v39, 4  ;;  %v733_v62 = vrot.slane %v662_v40, 4  ;;  %v707_v21 = vsel %vm704_vm10, %v701_v57, %v703_v18 }
 0x35b   :  { %v1169_v32 = vunpack.i.h.bf16 %v1167_v29  ;;  %v1168_v33 = vunpack.i.l.bf16 %v1167_v29 }
 0x35d   :  { %v640_v41 = vsel %vm638_vm9, %v1168_v33, %v1169_v32 }
 0x35e   :  { %v1177_v44 = vpop.permute.xlu1 %1176  ;;  %v756_v45 = vsel %vm89_vm0, %v640_v41, %v731_v37 }
 0x35f   :  { %v1179_v48 = vunpack.i.h.bf16 %v1177_v44  ;;  %v1178_v49 = vunpack.i.l.bf16 %v1177_v44  ;;  %v1086_v50 = vpack.c.bf16 %v760_v46, %v756_v45 }
 0x361   :  { %v639_v0 = vsel %vm638_vm9, %v1178_v49, %v1168_v33  ;;  %v641_v1 = vsel %vm638_vm9, %v1169_v32, %v1179_v48  ;;  %v647_v2 = vsel %vm638_vm9, %v1179_v48, %v1178_v49  ;;  %1087 = vmatprep.subr.bf16.mxu0 %v1086_v50 }
 0x362   :  { %v699_v5 = vpop.permute.xlu1 %698  ;;  %v755_v10 = vsel %vm89_vm0, %v639_v0, %v730_v59  ;;  %v758_v11 = vsel %vm89_vm0, %v647_v2, %v733_v62  ;;  %v757_v12 = vsel %vm89_vm0, %v641_v1, %v732_v60  ;;  %v1207_v59 = vmov 4  }
 0x363   :  { %v1088_v13 = vpack.c.bf16 %v759_v63, %v755_v10  ;;  %v1094_v14 = vpack.c.bf16 %v762_v4, %v758_v11  ;;  %v1096_v16 = vpack.c.bf16 %v761_v7, %v757_v12  ;;  %v706_v17 = vsel %vm704_vm10, %v699_v5, %v701_v57  ;;  %1186 = vset.pattern.permute.xlu1 %v1207_v59 }
 0x365   :  { %1089 = vmatpush1.bf16.msra.mxu0 %v1088_v13  ;;  %1095 = vmatprep.subr.bf16.mxu1 %v1094_v14 }
 0x366   :  { %v697_v15 = vpop.permute.xlu1 %696  ;;  %1012 = vmatprep.subr.msk.mxu0 %vm89_vm0, %v706_v17  ;;  %1097 = vmatpush1.bf16.msra.mxu1 %v1096_v16 }
 0x367   :  { %v705_v19 = vsel %vm704_vm10, %v697_v15, %v699_v5  ;;  %v710_v8 = vsel %vm704_vm10, %v703_v18, %v697_v15 }
 0x368   :  { %1015 = vmatprep.subr.msk.mxu1 %vm89_vm0, %v710_v8 }
 0x369   :  { %1013 = vmatpush1.msk.msra.mxu0 %vm89_vm0, %v705_v19 }
 0x36a   :  { %1014 = vmatmul.mubr.msk.f32.vlgmr.msra.gmra.mrb[4].mxu0 %vm343_vm2, %v763_v20  ;;  %1016 = vmatpush1.msk.msra.mxu1 %vm89_vm0, %v707_v21 }
 0x36b   :  { %1017 = vmatmul.mubr.msk.f32.vlgmr.msra.gmra.mrb[4].mxu1 %vm343_vm2, %v763_v20 }
 0x390   :  { %v277_v22 = vpop.xlane.xlu0 %276 }
 0x391   :  { %v278_v6 = vmul.f32 0.0034722222, %v277_v22 }
 0x393   :  { %v1634_v23 = vsub.f32 %v1505_v54, %v278_v6  ;;  %v1637_v24 = vsub.f32 %v1511_v56, %v278_v6  ;;  %v1644_v26 = vsub.f32 %v1515_v58, %v278_v6  ;;  %v1649_v29 = vsub.f32 %v1520_v61, %v278_v6 }
 0x395   :  { %v283_v25 = vmul.f32 %v1634_v23, %v1634_v23  ;;  %v284_v9 = vmul.f32 %v1637_v24, %v1637_v24  ;;  %v285_v56 = vmul.f32 %v1644_v26, %v1644_v26  ;;  %v286_v37 = vmul.f32 %v1649_v29, %v1649_v29 }
 0x397   :  { %v287_v27 = vmul.f32 %v283_v25, %v1499_v51  ;;  %v288_v28 = vmul.f32 %v284_v9, %v1501_v52  ;;  %v289_v41 = vmul.f32 %v285_v56, %v1503_v53  ;;  %v290_v46 = vmul.f32 %v286_v37, %v1507_v55 }
 0x398   :  { %v1210_v25 = vmov 2  }
 0x399   :  { %v291_v35 = vsel %vm89_vm0, %v287_v27, 0.0  ;;  %v292_v36 = vsel %vm89_vm0, %v288_v28, 0.0  ;;  %v294_v47 = vsel %vm89_vm0, %v289_v41, 0.0  ;;  %v296_v50 = vsel %vm89_vm0, %v290_v46, 0.0  ;;  %1185 = vset.pattern.permute.xlu0 %v1210_v25 }
 0x39a   :  { %v293_v43 = vadd.f32 %v292_v36, %v291_v35 }
 0x39c   :  { %v295_v49 = vadd.f32 %v294_v47, %v293_v43 }
 0x39e   :  { %v297_v57 = vadd.f32 %v296_v50, %v295_v49 }
 0x43d   :  { %v842_v54 = vpop.f32.mrb[4].mxu0 }
 0x43e   :  { %v918_v30 = vmul.f32 %v842_v54, %v1499_v51  ;;  %v844_v31 = vpop.f32.mrb[5].mxu0  ;;  %v913_v32 = vpop.f32.mrb[4].mxu1 }
 0x43f   :  { %v919_v33 = vmul.f32 %v844_v31, %v1501_v52  ;;  %v920_v58 = vmul.f32 %v913_v32, %v1503_v53  ;;  %v915_v34 = vpop.f32.mrb[5].mxu1 }
 0x440   :  { %v922_v61 = vsel %vm89_vm0, %v918_v30, 0.0  ;;  %v921_v40 = vmul.f32 %v915_v34, %v1507_v55 }
 0x441   :  { %v923_v38 = vsel %vm89_vm0, %v919_v33, 0.0  ;;  %v925_v39 = vsel %vm89_vm0, %v920_v58, 0.0 }
 0x442   :  { %v924_v42 = vadd.f32 %v923_v38, %v922_v61  ;;  %v927_v45 = vsel %vm89_vm0, %v921_v40, 0.0 }
 0x444   :  { %v926_v44 = vadd.f32 %v925_v39, %v924_v42 }
 0x446   :  { %v928_v48 = vadd.f32 %v927_v45, %v926_v44 }
 0x448   :  { %929 = vadd.xlane.f32.xlu1 %v928_v48 }
 0x44c   :  { %298 = vadd.xlane.f32.xlu1 %v297_v57 }
 0x4d5   :  { %v930_v60 = vpop.xlane.xlu1 %929 }
 0x4d6   :  { %v931_v62 = vmul.f32 0.0034722222, %v930_v60 }
 0x4d8   :  { %v932_v63 = vsub.f32 %v842_v54, %v931_v62  ;;  %v933_v0 = vsub.f32 %v844_v31, %v931_v62  ;;  %v934_v1 = vsub.f32 %v913_v32, %v931_v62  ;;  %v935_v2 = vsub.f32 %v915_v34, %v931_v62 }
 0x4d9   :  { %v299_v4 = vpop.xlane.xlu1 %298 }
 0x4da   :  { %v300_v5 = vmul.f32 0.0034722222, %v299_v4  ;;  %v936_v10 = vmul.f32 %v932_v63, %v932_v63  ;;  %v937_v11 = vmul.f32 %v933_v0, %v933_v0  ;;  %v938_v12 = vmul.f32 %v934_v1, %v934_v1 }
 0x4db   :  { %v939_v7 = vmul.f32 %v935_v2, %v935_v2 }
 0x4dc   :  { %v301_v13 = vadd.f32 1e-05, %v300_v5  ;;  %v940_v14 = vmul.f32 %v936_v10, %v1499_v51  ;;  %v941_v16 = vmul.f32 %v937_v11, %v1501_v52  ;;  %v942_v17 = vmul.f32 %v938_v12, %v1503_v53 }
 0x4dd   :  { %v943_v18 = vmul.f32 %v939_v7, %v1507_v55  ;;  %v1208_v53 = vmov 3   ;;  %v1209_v55 = vmov 5  }
 0x4de   :  { %1192 = vrsqrt.f32 %v301_v13  ;;  %v944_v15 = vsel %vm89_vm0, %v940_v14, 0.0  ;;  %v945_v19 = vsel %vm89_vm0, %v941_v16, 0.0  ;;  %v947_v20 = vsel %vm89_vm0, %v942_v17, 0.0 }
 0x4df   :  { %v946_v8 = vadd.f32 %v945_v19, %v944_v15  ;;  %v949_v22 = vsel %vm89_vm0, %v943_v18, 0.0 }
 0x4e1   :  { %v948_v21 = vadd.f32 %v947_v20, %v946_v8 }
 0x4e3   :  { %v950_v6 = vadd.f32 %v949_v22, %v948_v21 }
 0x4e5   :  { %951 = vadd.xlane.f32.xlu0 %v950_v6 }
 0x4e8   :  { %v1193_v51 = vpop.eup %1192 }
 0x4e9   :  { %v303_v52 = vmul.f32 %v1193_v51, %v1543_v3 }
 0x4eb   :  { %306 = vperm.xlu1 %1186, %v303_v52  }
 0x4ef   :  { %1187 = vset.pattern.permute.xlu1 %v1208_v53 }
 0x4f0   :  { %967 = vperm.xlu1 %1187, %v1543_v3  }
 0x4f4   :  { %1188 = vset.pattern.permute.xlu1 %v1209_v55 }
 0x4f5   :  { %315 = vperm.xlu1 %1188, %v1543_v3  }
 0x56a   :  { %v307_v30 = vpop.permute.xlu1 %306 }
 0x56b   :  { %v309_v61 = vmul.f32 %v307_v30, %v1634_v23  ;;  %v310_v37 = vmul.f32 %v307_v30, %v1637_v24  ;;  %v311_v38 = vmul.f32 %v307_v30, %v1644_v26  ;;  %v312_v39 = vmul.f32 %v307_v30, %v1649_v29 }
 0x56f   :  { %v968_v31 = vpop.permute.xlu1 %967 }
 0x572   :  { %v952_v9 = vpop.xlane.xlu0 %951 }
 0x573   :  { %v953_v27 = vmul.f32 0.0034722222, %v952_v9 }
 0x574   :  { %v316_v33 = vpop.permute.xlu1 %315 }
 0x575   :  { %v954_v28 = vadd.f32 1e-05, %v953_v27  ;;  %v318_v43 = vadd.f32 %v316_v33, %v309_v61  ;;  %v319_v44 = vadd.f32 %v316_v33, %v310_v37  ;;  %v320_v45 = vadd.f32 %v316_v33, %v311_v38 }
 0x576   :  { %v321_v46 = vadd.f32 %v316_v33, %v312_v39 }
 0x577   :  { %1194 = vrsqrt.f32 %v954_v28 }
 0x581   :  { %v1195_v54 = vpop.eup %1194 }
 0x582   :  { %v956_v56 = vmul.f32 %v1195_v54, %v1543_v3 }
 0x584   :  { %959 = vperm.xlu0 %1185, %v956_v56  }
 0x588   :  { %1189 = vset.pattern.permute.xlu0 %v1208_v53 }
 0x603   :  { %v960_v32 = vpop.permute.xlu0 %959 }
 0x604   :  { %v962_v58 = vmul.f32 %v960_v32, %v932_v63  ;;  %v963_v34 = vmul.f32 %v960_v32, %v933_v0  ;;  %v964_v35 = vmul.f32 %v960_v32, %v934_v1  ;;  %v965_v36 = vmul.f32 %v960_v32, %v935_v2 }
 0x606   :  { %v970_v40 = vadd.f32 %v968_v31, %v962_v58  ;;  %v971_v3 = vadd.f32 %v968_v31, %v963_v34  ;;  %v972_v41 = vadd.f32 %v968_v31, %v964_v35  ;;  %v973_v42 = vadd.f32 %v968_v31, %v965_v36 }
 0x608   :  { %v974_v47 = vmax.f32 %v970_v40, 0.0  ;;  %v975_v48 = vmax.f32 %v971_v3, 0.0  ;;  %v976_v49 = vmax.f32 %v972_v41, 0.0  ;;  %v977_v50 = vmax.f32 %v973_v42, 0.0 }
 0x60a   :  { %v978_v57 = vadd.f32 %v974_v47, %v318_v43  ;;  %v979_v23 = vadd.f32 %v975_v48, %v319_v44  ;;  %v980_v59 = vadd.f32 %v976_v49, %v320_v45  ;;  %v981_v24 = vadd.f32 %v977_v50, %v321_v46 }
 0x60c   :  { %v982_v60 = vmax.f32 %v978_v57, 0.0  ;;  %v983_v26 = vmax.f32 %v979_v23, 0.0  ;;  %v984_v62 = vmax.f32 %v980_v59, 0.0  ;;  %v985_v29 = vmax.f32 %v981_v24, 0.0 }
 0x60e   :  { %v990_v63 = vcombine.low %v982_v60, %v983_v26  ;;  %v991_v0 = vcombine.low %v984_v62, %v985_v29 }
 0x610   :  { %994 = vst [vmem:[%s1699_s8] sm:$0xff] %v990_v63  ;;  %995 = vst [vmem:[%s1699_s8 + $0x8] sm:$0xff] %v991_v0 }

</bundles_post_ra>
